<compile_context>
chip_gen: v7x
topology: tpu7x:2x2x1
jax: 0.10.0
libtpu: 0.0.40
codegen_flags: <defaults>
</compile_context>

<pallas_src>
import jax
import jax.numpy as jnp
from jax.experimental import pallas as pl
from jax.experimental.pallas import tpu as pltpu

# ----------------------------- config ---------------------------------------
HIDDEN = 32          # hidden_size
INTER = 64           # intermediate_size
NUM_EXPERTS = 8
NUM_SHARED = 1
NUM_ROUTED = NUM_EXPERTS - NUM_SHARED   # 7
TOP_K = 2
BATCH = 2
SEQ = 8


# ----------------------------- Pallas kernel --------------------------------
def moe_fused_kernel(x_ref, wexp_ref, guw_ref, dw_ref, out_ref):
    """Single-invocation fused MoE SwiGLU.

    x_ref    : [T, H]        tokens
    wexp_ref : [T, E*I]      per-token expert weight, pre-broadcast over I
    guw_ref  : [H, 2*E*I]    [ all gate_proj | all up_proj ], expert-major cols
    dw_ref   : [E*I, H]      all down_proj, expert-major rows
    out_ref  : [T, H]
    """
    x = x_ref[...]                                                     # [T, H]
    # One lane-dense MXU matmul for every expert's gate AND up projection.
    gu = jnp.dot(x, guw_ref[...], preferred_element_type=jnp.float32)  # [T, 2*E*I]
    half = gu.shape[-1] // 2            # = E*I, multiple of 128 -> aligned slice
    g = gu[:, :half]                                                   # gates
    u = gu[:, half:]                                                   # ups
    h = g * jax.nn.sigmoid(g) * u                                      # SwiGLU (f32 VPU/EUP)
    # Fold routing weights into h (linear in h), then one matmul does both the
    # down projection and the weighted sum over all experts (K = E*I, f32 acc).
    hw = h * wexp_ref[...]                                             # [T, E*I]
    out_ref[...] = jnp.dot(hw, dw_ref[...], preferred_element_type=jnp.float32)


def moe_pallas(x2d, wexp, guw, dw):
    """x2d: [T, H]; wexp: [T, E*I]; guw: [H, 2*E*I]; dw: [E*I, H] -> [T, H]."""
    T, H = x2d.shape
    vmem = lambda: pl.BlockSpec(memory_space=pltpu.MemorySpace.VMEM)
    return pl.pallas_call(
        moe_fused_kernel,
        out_shape=jax.ShapeDtypeStruct((T, H), jnp.float32),
        in_specs=[vmem(), vmem(), vmem(), vmem()],   # whole arrays resident in VMEM
        out_specs=vmem(),
    )(x2d, wexp, guw, dw)


# ----------------------------- weight packing --------------------------------
def pack_expert_weights(gate_w, up_w, down_w):
    """Pack stacked per-expert weights into the fused layouts used by the kernel."""
    E, H, I = gate_w.shape
    g_cols = jnp.transpose(gate_w, (1, 0, 2)).reshape(H, E * I)   # col e*I+j = gate_e[:, j]
    u_cols = jnp.transpose(up_w, (1, 0, 2)).reshape(H, E * I)     # col e*I+j = up_e[:, j]
    guw = jnp.concatenate([g_cols, u_cols], axis=1)               # [H, 2*E*I]
    dw = down_w.reshape(E * I, H)                                 # row e*I+j = down_e[j, :]
    return guw, dw


# ----------------------------- module wrapper --------------------------------
@jax.jit
def llama_mlp_forward(x, params):
    """x: [B, S, H] float32. Returns [B, S, H] float32."""
    B, S, H = x.shape
    T = B * S
    x2 = x.reshape(T, H)

    # --- routing (glue, plain JAX) ---
    logits = x2 @ params["router_w"] + params["routing_bias"]            # [T, R]
    probs = jax.nn.softmax(logits, axis=-1)
    scores, indices = jax.lax.top_k(probs, TOP_K)                        # [T, K]
    scores = scores / jnp.sum(scores, axis=-1, keepdims=True)

    routed_w = jnp.zeros((T, NUM_ROUTED), x2.dtype)
    for k in range(TOP_K):
        routed_w = routed_w + (
            jax.nn.one_hot(indices[:, k], NUM_ROUTED, dtype=x2.dtype) * scores[:, k:k + 1]
        )
    shared_w = jnp.full((T, NUM_SHARED), 1.0 / NUM_SHARED, dtype=x2.dtype)
    weights = jnp.concatenate([shared_w, routed_w], axis=1)              # [T, E]
    # Pre-broadcast routing weight over each expert's I columns (toy-size only;
    # at production scale this stays [T, E] / grouped-matmul metadata).
    wexp = jnp.repeat(weights, INTER, axis=1)                            # [T, E*I]

    # --- expert hot path (Pallas) ---
    guw, dw = pack_expert_weights(params["gate_w"], params["up_w"], params["down_w"])
    out = moe_pallas(x2, wexp, guw, dw)
    return out.reshape(B, S, H)


# ----------------------------- pure-JAX reference ----------------------------
def _expert_ref(x2, gw, uw, dw):
    g = x2 @ gw
    u = x2 @ uw
    return (g * jax.nn.sigmoid(g) * u) @ dw


def llama_mlp_reference(x, params):
    B, S, H = x.shape
    x2 = x.reshape(-1, H)
    shared = sum(
        _expert_ref(x2, params["gate_w"][i], params["up_w"][i], params["down_w"][i])
        for i in range(NUM_SHARED)
    )
    if NUM_SHARED > 1:
        shared = shared / NUM_SHARED
    logits = x2 @ params["router_w"] + params["routing_bias"]
    probs = jax.nn.softmax(logits, axis=-1)
    scores, indices = jax.lax.top_k(probs, TOP_K)
    scores = scores / jnp.sum(scores, axis=-1, keepdims=True)
    combined = jnp.zeros_like(x2)
    for k in range(TOP_K):
        for i in range(NUM_ROUTED):
            mask = (indices[:, k] == i)[:, None].astype(x2.dtype)
            eo = _expert_ref(x2,
                             params["gate_w"][NUM_SHARED + i],
                             params["up_w"][NUM_SHARED + i],
                             params["down_w"][NUM_SHARED + i])
            combined = combined + mask * scores[:, k:k + 1] * eo
    return (shared + combined).reshape(B, S, H)


# ----------------------------- params & main ---------------------------------
def init_params(key):
    ks = jax.random.split(key, 5)
    scale = 0.05
    return {
        # expert index 0..NUM_SHARED-1 = shared experts, rest = routed experts
        "gate_w": scale * jax.random.normal(ks[0], (NUM_EXPERTS, HIDDEN, INTER), jnp.float32),
        "up_w":   scale * jax.random.normal(ks[1], (NUM_EXPERTS, HIDDEN, INTER), jnp.float32),
        "down_w": scale * jax.random.normal(ks[2], (NUM_EXPERTS, INTER, HIDDEN), jnp.float32),
        "router_w": scale * jax.random.normal(ks[3], (HIDDEN, NUM_ROUTED), jnp.float32),
        "routing_bias": jnp.zeros((NUM_ROUTED,), jnp.float32),
    }


if __name__ == "__main__":
    key = jax.random.PRNGKey(0)
    kp, kx = jax.random.split(key)
    params = init_params(kp)
    x = jax.random.normal(kx, (BATCH, SEQ, HIDDEN), jnp.float32)

    out = jax.block_until_ready(llama_mlp_forward(x, params))
    ref = jax.block_until_ready(llama_mlp_reference(x, params))

    assert out.shape == (BATCH, SEQ, HIDDEN)
    err = float(jnp.max(jnp.abs(out - ref)))
    assert jnp.allclose(out, ref, atol=1e-5, rtol=1e-5), err
    print("KERNEL_OK")
</pallas_src>

<mosaic_0001>
module attributes {stable_mosaic.version = 11 : i64} {
  func.func @moe_fused_kernel(%arg0: memref<16x32xf32, #tpu.memory_space<vmem>>, %arg1: memref<16x512xf32, #tpu.memory_space<vmem>>, %arg2: memref<32x1024xf32, #tpu.memory_space<vmem>>, %arg3: memref<512x32xf32, #tpu.memory_space<vmem>>, %arg4: memref<16x32xf32, #tpu.memory_space<vmem>>) attributes {dimension_semantics = [], scalar_prefetch = 0 : i64, scratch_operands = 0 : i64, tpu.core_type = #tpu.core_type<tc>} {
    %c0 = arith.constant 0 : index
    %c0_0 = arith.constant 0 : index
    %0 = vector.load %arg0[%c0, %c0_0] : memref<16x32xf32, #tpu.memory_space<vmem>>, vector<16x32xf32>
    %c0_1 = arith.constant 0 : index
    %c0_2 = arith.constant 0 : index
    %1 = vector.load %arg2[%c0_1, %c0_2] : memref<32x1024xf32, #tpu.memory_space<vmem>>, vector<32x1024xf32>
    %cst = arith.constant dense<0.000000e+00> : vector<16x1024xf32>
    %2 = tpu.matmul %0, %1, %cst {dimension_numbers = #tpu.dot_dimension_numbers<[1], [0], [0], [1], [0, 0, 1, 1], [], []>} : vector<16x32xf32>, vector<32x1024xf32>, vector<16x1024xf32> -> vector<16x1024xf32>
    %3 = vector.extract_strided_slice %2 {offsets = [0, 0], sizes = [16, 512], strides = [1, 1]} : vector<16x1024xf32> to vector<16x512xf32>
    %4 = vector.extract_strided_slice %2 {offsets = [0, 512], sizes = [16, 512], strides = [1, 1]} : vector<16x1024xf32> to vector<16x512xf32>
    %5 = arith.negf %3 : vector<16x512xf32>
    %6 = math.exp %5 : vector<16x512xf32>
    %cst_3 = arith.constant 1.000000e+00 : f32
    %7 = vector.broadcast %cst_3 : f32 to vector<16x512xf32>
    %8 = arith.addf %7, %6 : vector<16x512xf32>
    %9 = arith.divf %7, %8 : vector<16x512xf32>
    %10 = arith.mulf %3, %9 : vector<16x512xf32>
    %11 = arith.mulf %10, %4 : vector<16x512xf32>
    %c0_4 = arith.constant 0 : index
    %c0_5 = arith.constant 0 : index
    %12 = vector.load %arg1[%c0_4, %c0_5] : memref<16x512xf32, #tpu.memory_space<vmem>>, vector<16x512xf32>
    %13 = arith.mulf %11, %12 : vector<16x512xf32>
    %c0_6 = arith.constant 0 : index
    %c0_7 = arith.constant 0 : index
    %14 = vector.load %arg3[%c0_6, %c0_7] : memref<512x32xf32, #tpu.memory_space<vmem>>, vector<512x32xf32>
    %cst_8 = arith.constant dense<0.000000e+00> : vector<16x32xf32>
    %15 = tpu.matmul %13, %14, %cst_8 {dimension_numbers = #tpu.dot_dimension_numbers<[1], [0], [0], [1], [0, 0, 1, 1], [], []>} : vector<16x512xf32>, vector<512x32xf32>, vector<16x32xf32> -> vector<16x32xf32>
    %c0_9 = arith.constant 0 : index
    %c0_10 = arith.constant 0 : index
    %16 = vector.load %arg4[%c0_9, %c0_10] : memref<16x32xf32, #tpu.memory_space<vmem>>, vector<16x32xf32>
    tpu.vector_store %arg4[%c0_9, %c0_10], %15 {strides = array<i32>} : memref<16x32xf32, #tpu.memory_space<vmem>>, vector<16x32xf32>,
    return
  }
}

</mosaic_0001>

<bundles_post_ra>
// kernel: llama_mlp_forward.1
= control target key start
LH: loop header
LB: loop body
LE: loop exit
PB: predicated region body
PF: predicated region fallthrough
CT: control target
= control target key end

     0   :  { %v927_v7 = vmov 0.0   ;;  %vm52_vm0 = vcmask 261120   ;;  %s1312_s0 = inlined_call_operand.vmem [shape: f32[16,32], index: 0, kind: input, shape index: {}]   ;;  %s1313_s1 = inlined_call_operand.vmem [shape: f32[16,512], index: 1, kind: input, shape index: {}]   ;;  %s1314_s2 = inlined_call_operand.vmem [shape: f32[32,1024], index: 2, kind: input, shape index: {}]   ;;  %s1315_s3 = inlined_call_operand.vmem [shape: f32[512,32], index: 3, kind: input, shape index: {}]   ;;  %s1316_s4 = inlined_call_operand.hbm [shape: f32[16,32], index: 4, kind: output, shape index: {}]  }
   0x1   :  { %v21_v0 = vld [vmem:[%s1314_s2 + $0x8] sm:$0xff]  ;;  %v23_v2 = vld [vmem:[%s1314_s2 + $0x18] sm:$0xff]  ;;  %v20_v5 = vld [vmem:[%s1314_s2] sm:$0xff]  ;;  %123 = vmatprep.mubr.f32.mxu0 %v927_v7  ;;  %200 = vmatprep.mubr.f32.mxu1 %v927_v7 }
   0x2   :  { %v29_v1 = vld [vmem:[%s1314_s2 + $0x48] sm:$0xff]  ;;  %v31_v4 = vld [vmem:[%s1314_s2 + $0x58] sm:$0xff]  ;;  %v28_v6 = vld [vmem:[%s1314_s2 + $0x40] sm:$0xff] }
   0x3   :  { %v771_v3 = vpack.c.bf16 %v29_v1, %v21_v0  ;;  %v779_v8 = vpack.c.bf16 %v31_v4, %v23_v2  ;;  %v773_v9 = vpack.c.bf16 %v28_v6, %v20_v5  ;;  %v22_v10 = vld [vmem:[%s1314_s2 + $0x10] sm:$0xff]  ;;  %v37_v12 = vld [vmem:[%s1314_s2 + $0x88] sm:$0xff]  ;;  %v39_v15 = vld [vmem:[%s1314_s2 + $0x98] sm:$0xff] }
   0x4   :  { %v30_v11 = vld [vmem:[%s1314_s2 + $0x50] sm:$0xff]  ;;  %v45_v14 = vld [vmem:[%s1314_s2 + $0xc8] sm:$0xff]  ;;  %v47_v16 = vld [vmem:[%s1314_s2 + $0xd8] sm:$0xff] }
   0x5   :  { %772 = vmatprep.subr.bf16.mxu0 %v771_v3  ;;  %v781_v13 = vpack.c.bf16 %v30_v11, %v22_v10  ;;  %780 = vmatprep.subr.bf16.mxu1 %v779_v8  ;;  %v775_v17 = vpack.c.bf16 %v45_v14, %v37_v12  ;;  %v783_v18 = vpack.c.bf16 %v47_v16, %v39_v15  ;;  %v36_v19 = vld [vmem:[%s1314_s2 + $0x80] sm:$0xff]  ;;  %v38_v21 = vld [vmem:[%s1314_s2 + $0x90] sm:$0xff]  ;;  %v25_v26 = vld [vmem:[%s1314_s2 + $0x28] sm:$0xff] }
   0x6   :  { %774 = vmatpush1.bf16.msra.mxu0 %v773_v9  ;;  %v44_v20 = vld [vmem:[%s1314_s2 + $0xc0] sm:$0xff]  ;;  %v46_v23 = vld [vmem:[%s1314_s2 + $0xd0] sm:$0xff]  ;;  %v33_v27 = vld [vmem:[%s1314_s2 + $0x68] sm:$0xff] }
   0x7   :  { %782 = vmatpush1.bf16.msra.mxu1 %v781_v13  ;;  %v777_v22 = vpack.c.bf16 %v44_v20, %v36_v19  ;;  %776 = vmatprep.subr.bf16.mxu0 %v775_v17  ;;  %v785_v24 = vpack.c.bf16 %v46_v23, %v38_v21  ;;  %v18_v25 = vld [vmem:[%s1312_s0] sm:$0xff]  ;;  %v27_v28 = vld [vmem:[%s1314_s2 + $0x38] sm:$0xff]  ;;  %v787_v29 = vpack.c.bf16 %v33_v27, %v25_v26  ;;  %v26_v34 = vld [vmem:[%s1314_s2 + $0x30] sm:$0xff] }
   0x8   :  { %784 = vmatprep.subr.bf16.mxu1 %v783_v18  ;;  %v35_v30 = vld [vmem:[%s1314_s2 + $0x78] sm:$0xff]  ;;  %v24_v31 = vld [vmem:[%s1314_s2 + $0x20] sm:$0xff]  ;;  %v34_v35 = vld [vmem:[%s1314_s2 + $0x70] sm:$0xff] }
   0x9   :  { %v32_v32 = vld [vmem:[%s1314_s2 + $0x60] sm:$0xff]  ;;  %v795_v33 = vpack.c.bf16 %v35_v30, %v27_v28  ;;  %v41_v36 = vld [vmem:[%s1314_s2 + $0xa8] sm:$0xff]  ;;  %v43_v39 = vld [vmem:[%s1314_s2 + $0xb8] sm:$0xff]  ;;  %v797_v41 = vpack.c.bf16 %v34_v35, %v26_v34 }
   0xa   :  { %778 = vmatpush1.bf16.msra.mxu0 %v777_v22  ;;  %v789_v37 = vpack.c.bf16 %v32_v32, %v24_v31  ;;  %v49_v38 = vld [vmem:[%s1314_s2 + $0xe8] sm:$0xff]  ;;  %v51_v40 = vld [vmem:[%s1314_s2 + $0xf8] sm:$0xff]  ;;  %v40_v43 = vld [vmem:[%s1314_s2 + $0xa0] sm:$0xff] }
   0xb   :  { %786 = vmatpush1.bf16.msra.mxu1 %v785_v24  ;;  %788 = vmatprep.subr.bf16.mxu0 %v787_v29  ;;  %v791_v42 = vpack.c.bf16 %v49_v38, %v41_v36  ;;  %v48_v44 = vld [vmem:[%s1314_s2 + $0xe0] sm:$0xff]  ;;  %v799_v45 = vpack.c.bf16 %v51_v40, %v43_v39  ;;  %v42_v46 = vld [vmem:[%s1314_s2 + $0xb0] sm:$0xff] }
   0xc   :  { %796 = vmatprep.subr.bf16.mxu1 %v795_v33  ;;  %v50_v47 = vld [vmem:[%s1314_s2 + $0xf0] sm:$0xff] }
   0xd   :  { %679 = vmatmul.mubr.msk.f32.vlgmr.msra.gmra.mrb[0].mxu0 %vm52_vm0, %v18_v25 }
   0xe   :  { %9 = vsyncpa [#allocation3], 0  ;;  %681 = vmatmul.mubr.msk.f32.vlgmr.msra.gmra.mrb[0].mxu1 %vm52_vm0, %v18_v25  ;;  %129 = vmatprep.mubr.f32.mxu0 %v927_v7  ;;  %v19_v48 = vld [vmem:[%s1312_s0 + $0x8] sm:$0xff]  ;;  %v793_v49 = vpack.c.bf16 %v48_v44, %v40_v43  ;;  %v801_v50 = vpack.c.bf16 %v50_v47, %v42_v46  ;;  %v463_v51 = vld [vmem:[%s1315_s3 + $0x80] sm:$0xff] }
   0xf   :  { %206 = vmatprep.mubr.f32.mxu1 %v927_v7  ;;  %790 = vmatpush1.bf16.msra.mxu0 %v789_v37  ;;  %v464_v52 = vld [vmem:[%s1315_s3 + $0x88] sm:$0xff]  ;;  %v495_v53 = vld [vmem:[%s1315_s3 + $0x180] sm:$0xff]  ;;  %v465_v63 = vld [vmem:[%s1315_s3 + $0x90] sm:$0xff] }
  0x10   :  { %798 = vmatpush1.bf16.msra.mxu1 %v797_v41  ;;  %792 = vmatprep.subr.bf16.mxu0 %v791_v42  ;;  %v803_v54 = vpack.c.bf16 %v464_v52, %v463_v51  ;;  %v496_v55 = vld [vmem:[%s1315_s3 + $0x188] sm:$0xff]  ;;  %v447_v56 = vld [vmem:[%s1315_s3] sm:$0xff]  ;;  %v466_v0 = vld [vmem:[%s1315_s3 + $0x98] sm:$0xff] }
  0x11   :  { %680 = vmatmul.mubr.msk.f32.gmra.mrb[2].mxu0 %vm52_vm0, %v19_v48  ;;  %800 = vmatprep.subr.bf16.mxu1 %v799_v45  ;;  %v448_v57 = vld [vmem:[%s1315_s3 + $0x8] sm:$0xff]  ;;  %v835_v58 = vpack.c.bf16 %v496_v55, %v495_v53  ;;  %v479_v60 = vld [vmem:[%s1315_s3 + $0x100] sm:$0xff]  ;;  %v497_v1 = vld [vmem:[%s1315_s3 + $0x190] sm:$0xff]  ;;  %v807_v2 = vpack.c.bf16 %v466_v0, %v465_v63 }
  0x12   :  { %682 = vmatmul.mubr.msk.f32.gmra.mrb[2].mxu1 %vm52_vm0, %v19_v48  ;;  %277 = vmatprep.mubr.f32.mxu0 %v927_v7  ;;  %v805_v59 = vpack.c.bf16 %v448_v57, %v447_v56  ;;  %v480_v61 = vld [vmem:[%s1315_s3 + $0x108] sm:$0xff]  ;;  %v498_v3 = vld [vmem:[%s1315_s3 + $0x198] sm:$0xff]  ;;  %v449_v4 = vld [vmem:[%s1315_s3 + $0x10] sm:$0xff] }
  0x13   :  { %794 = vmatpush1.bf16.msra.mxu0 %v793_v49  ;;  %354 = vmatprep.mubr.f32.mxu1 %v927_v7  ;;  %v837_v62 = vpack.c.bf16 %v480_v61, %v479_v60  ;;  %v450_v5 = vld [vmem:[%s1315_s3 + $0x18] sm:$0xff]  ;;  %v839_v6 = vpack.c.bf16 %v498_v3, %v497_v1  ;;  %v481_v8 = vld [vmem:[%s1315_s3 + $0x110] sm:$0xff]  ;;  %v467_v11 = vld [vmem:[%s1315_s3 + $0xa0] sm:$0xff] }
  0x14   :  { %802 = vmatpush1.bf16.msra.mxu1 %v801_v50  ;;  %804 = vmatprep.subr.bf16.mxu0 %v803_v54  ;;  %v482_v9 = vld [vmem:[%s1315_s3 + $0x118] sm:$0xff]  ;;  %v468_v12 = vld [vmem:[%s1315_s3 + $0xa8] sm:$0xff]  ;;  %v499_v13 = vld [vmem:[%s1315_s3 + $0x1a0] sm:$0xff] }
  0x15   :  { %836 = vmatprep.subr.bf16.mxu1 %v835_v58  ;;  %v841_v10 = vpack.c.bf16 %v482_v9, %v481_v8  ;;  %v811_v14 = vpack.c.bf16 %v468_v12, %v467_v11  ;;  %v500_v15 = vld [vmem:[%s1315_s3 + $0x1a8] sm:$0xff]  ;;  %v451_v16 = vld [vmem:[%s1315_s3 + $0x20] sm:$0xff]  ;;  %v469_v23 = vld [vmem:[%s1315_s3 + $0xb0] sm:$0xff] }
  0x16   :  { %683 = vmatmul.mubr.msk.f32.vlgmr.msra.gmra.mrb[4].mxu0 %vm52_vm0, %v18_v25  ;;  %v452_v17 = vld [vmem:[%s1315_s3 + $0x28] sm:$0xff]  ;;  %v843_v18 = vpack.c.bf16 %v500_v15, %v499_v13  ;;  %v483_v20 = vld [vmem:[%s1315_s3 + $0x120] sm:$0xff]  ;;  %v470_v24 = vld [vmem:[%s1315_s3 + $0xb8] sm:$0xff] }
  0x17   :  { %685 = vmatmul.mubr.msk.f32.vlgmr.msra.gmra.mrb[4].mxu1 %vm52_vm0, %v18_v25  ;;  %283 = vmatprep.mubr.f32.mxu0 %v927_v7  ;;  %v813_v19 = vpack.c.bf16 %v452_v17, %v451_v16  ;;  %v484_v21 = vld [vmem:[%s1315_s3 + $0x128] sm:$0xff]  ;;  %v501_v25 = vld [vmem:[%s1315_s3 + $0x1b0] sm:$0xff]  ;;  %v815_v26 = vpack.c.bf16 %v470_v24, %v469_v23  ;;  %v502_v27 = vld [vmem:[%s1315_s3 + $0x1b8] sm:$0xff] }
  0x18   :  { %360 = vmatprep.mubr.f32.mxu1 %v927_v7  ;;  %806 = vmatpush3.bf16.msra.mxu0 %v805_v59  ;;  %v809_v7 = vpack.c.bf16 %v450_v5, %v449_v4  ;;  %v845_v22 = vpack.c.bf16 %v484_v21, %v483_v20  ;;  %v453_v28 = vld [vmem:[%s1315_s3 + $0x30] sm:$0xff]  ;;  %v454_v29 = vld [vmem:[%s1315_s3 + $0x38] sm:$0xff]  ;;  %v847_v30 = vpack.c.bf16 %v502_v27, %v501_v25  ;;  %v471_v35 = vld [vmem:[%s1315_s3 + $0xc0] sm:$0xff] }
  0x19   :  { %838 = vmatpush3.bf16.msra.mxu1 %v837_v62  ;;  %808 = vmatprep.subr.bf16.mxu0 %v807_v2  ;;  %v817_v31 = vpack.c.bf16 %v454_v29, %v453_v28  ;;  %v485_v32 = vld [vmem:[%s1315_s3 + $0x130] sm:$0xff]  ;;  %v486_v33 = vld [vmem:[%s1315_s3 + $0x138] sm:$0xff]  ;;  %v472_v36 = vld [vmem:[%s1315_s3 + $0xc8] sm:$0xff] }
  0x1a   :  { %684 = vmatmul.mubr.msk.f32.gmra.mrb[6].mxu0 %vm52_vm0, %v19_v48  ;;  %840 = vmatprep.subr.bf16.mxu1 %v839_v6  ;;  %v849_v34 = vpack.c.bf16 %v486_v33, %v485_v32  ;;  %v503_v37 = vld [vmem:[%s1315_s3 + $0x1c0] sm:$0xff]  ;;  %v819_v38 = vpack.c.bf16 %v472_v36, %v471_v35  ;;  %v504_v39 = vld [vmem:[%s1315_s3 + $0x1c8] sm:$0xff]  ;;  %v473_v47 = vld [vmem:[%s1315_s3 + $0xd0] sm:$0xff] }
  0x1b   :  { %686 = vmatmul.mubr.msk.f32.gmra.mrb[6].mxu1 %vm52_vm0, %v19_v48  ;;  %v455_v40 = vld [vmem:[%s1315_s3 + $0x40] sm:$0xff]  ;;  %v456_v41 = vld [vmem:[%s1315_s3 + $0x48] sm:$0xff]  ;;  %v851_v42 = vpack.c.bf16 %v504_v39, %v503_v37  ;;  %v474_v48 = vld [vmem:[%s1315_s3 + $0xd8] sm:$0xff] }
  0x1c   :  { %810 = vmatpush3.bf16.msra.mxu0 %v809_v7  ;;  %v821_v43 = vpack.c.bf16 %v456_v41, %v455_v40  ;;  %v487_v44 = vld [vmem:[%s1315_s3 + $0x140] sm:$0xff]  ;;  %v488_v45 = vld [vmem:[%s1315_s3 + $0x148] sm:$0xff]  ;;  %v505_v49 = vld [vmem:[%s1315_s3 + $0x1d0] sm:$0xff]  ;;  %v823_v50 = vpack.c.bf16 %v474_v48, %v473_v47 }
  0x1d   :  { %842 = vmatpush3.bf16.msra.mxu1 %v841_v10  ;;  %812 = vmatprep.subr.bf16.mxu0 %v811_v14  ;;  %v853_v46 = vpack.c.bf16 %v488_v45, %v487_v44  ;;  %v506_v51 = vld [vmem:[%s1315_s3 + $0x1d8] sm:$0xff]  ;;  %v457_v52 = vld [vmem:[%s1315_s3 + $0x50] sm:$0xff]  ;;  %v475_v59 = vld [vmem:[%s1315_s3 + $0xe0] sm:$0xff] }
  0x1e   :  { %844 = vmatprep.subr.bf16.mxu1 %v843_v18  ;;  %v458_v53 = vld [vmem:[%s1315_s3 + $0x58] sm:$0xff]  ;;  %v855_v54 = vpack.c.bf16 %v506_v51, %v505_v49  ;;  %v489_v56 = vld [vmem:[%s1315_s3 + $0x150] sm:$0xff]  ;;  %v476_v60 = vld [vmem:[%s1315_s3 + $0xe8] sm:$0xff] }
  0x1f   :  { %v825_v55 = vpack.c.bf16 %v458_v53, %v457_v52  ;;  %v490_v57 = vld [vmem:[%s1315_s3 + $0x158] sm:$0xff]  ;;  %v507_v61 = vld [vmem:[%s1315_s3 + $0x1e0] sm:$0xff]  ;;  %v827_v62 = vpack.c.bf16 %v476_v60, %v475_v59  ;;  %v508_v63 = vld [vmem:[%s1315_s3 + $0x1e8] sm:$0xff] }
  0x20   :  { %814 = vmatpush3.bf16.msra.mxu0 %v813_v19  ;;  %v857_v58 = vpack.c.bf16 %v490_v57, %v489_v56  ;;  %v459_v0 = vld [vmem:[%s1315_s3 + $0x60] sm:$0xff]  ;;  %v460_v1 = vld [vmem:[%s1315_s3 + $0x68] sm:$0xff]  ;;  %v859_v2 = vpack.c.bf16 %v508_v63, %v507_v61  ;;  %v477_v7 = vld [vmem:[%s1315_s3 + $0xf0] sm:$0xff] }
  0x21   :  { %846 = vmatpush3.bf16.msra.mxu1 %v845_v22  ;;  %816 = vmatprep.subr.bf16.mxu0 %v815_v26  ;;  %v829_v3 = vpack.c.bf16 %v460_v1, %v459_v0  ;;  %v491_v4 = vld [vmem:[%s1315_s3 + $0x160] sm:$0xff]  ;;  %v492_v5 = vld [vmem:[%s1315_s3 + $0x168] sm:$0xff]  ;;  %v478_v8 = vld [vmem:[%s1315_s3 + $0xf8] sm:$0xff] }
  0x22   :  { %848 = vmatprep.subr.bf16.mxu1 %v847_v30  ;;  %v861_v6 = vpack.c.bf16 %v492_v5, %v491_v4  ;;  %v509_v9 = vld [vmem:[%s1315_s3 + $0x1f0] sm:$0xff]  ;;  %v831_v10 = vpack.c.bf16 %v478_v8, %v477_v7  ;;  %v510_v11 = vld [vmem:[%s1315_s3 + $0x1f8] sm:$0xff] }
  0x23   :  { %v461_v12 = vld [vmem:[%s1315_s3 + $0x70] sm:$0xff]  ;;  %v462_v13 = vld [vmem:[%s1315_s3 + $0x78] sm:$0xff]  ;;  %v863_v14 = vpack.c.bf16 %v510_v11, %v509_v9  ;;  %v431_v9 = vld [vmem:[%s1313_s1] sm:$0xff] }
  0x24   :  { %818 = vmatpush3.bf16.msra.mxu0 %v817_v31  ;;  %v833_v15 = vpack.c.bf16 %v462_v13, %v461_v12  ;;  %v493_v16 = vld [vmem:[%s1315_s3 + $0x170] sm:$0xff]  ;;  %v494_v17 = vld [vmem:[%s1315_s3 + $0x178] sm:$0xff] }
  0x25   :  { %850 = vmatpush3.bf16.msra.mxu1 %v849_v34  ;;  %820 = vmatprep.subr.bf16.mxu0 %v819_v38  ;;  %v865_v18 = vpack.c.bf16 %v494_v17, %v493_v16  ;;  %v434_v11 = vld [vmem:[%s1313_s1 + $0x18] sm:$0xff] }
  0x26   :  { %852 = vmatprep.subr.bf16.mxu1 %v851_v42 }
  0x28   :  { %822 = vmatpush3.bf16.msra.mxu0 %v821_v43 }
  0x29   :  { %854 = vmatpush3.bf16.msra.mxu1 %v853_v46  ;;  %824 = vmatprep.subr.bf16.mxu0 %v823_v50 }
  0x2a   :  { %856 = vmatprep.subr.bf16.mxu1 %v855_v54 }
  0x2c   :  { %826 = vmatpush3.bf16.msra.mxu0 %v825_v55 }
  0x2d   :  { %858 = vmatpush3.bf16.msra.mxu1 %v857_v58  ;;  %828 = vmatprep.subr.bf16.mxu0 %v827_v62 }
  0x2e   :  { %860 = vmatprep.subr.bf16.mxu1 %v859_v2 }
  0x30   :  { %830 = vmatpush3.bf16.msra.mxu0 %v829_v3 }
  0x31   :  { %862 = vmatpush3.bf16.msra.mxu1 %v861_v6  ;;  %832 = vmatprep.subr.bf16.mxu0 %v831_v10  ;;  %v432_v6 = vld [vmem:[%s1313_s1 + $0x8] sm:$0xff] }
  0x32   :  { %864 = vmatprep.subr.bf16.mxu1 %v863_v14  ;;  %v433_v14 = vld [vmem:[%s1313_s1 + $0x10] sm:$0xff] }
  0x34   :  { %834 = vmatpush3.bf16.msra.mxu0 %v833_v15 }
  0x35   :  { %866 = vmatpush3.bf16.msra.mxu1 %v865_v18 }
  0xe0   :  { %v125_v19 = vpop.f32.mrb[0].mxu0 }
  0xe1   :  { %v687_v20 = vmul.f32 -1.442695, %v125_v19  ;;  %v202_v21 = vpop.f32.mrb[0].mxu1  ;;  %v127_v22 = vpop.f32.mrb[1].mxu0 }
  0xe2   :  { %v689_v23 = vmul.f32 -1.442695, %v202_v21  ;;  %v688_v24 = vmul.f32 -1.442695, %v127_v22  ;;  %v204_v25 = vpop.f32.mrb[1].mxu1 }
  0xe3   :  { %871 = vpow2.f32 %v687_v20  ;;  %v690_v26 = vmul.f32 -1.442695, %v204_v25 }
  0xe4   :  { %873 = vpow2.f32 %v689_v23  ;;  %v131_v27 = vpop.f32.mrb[2].mxu0 }
  0xe5   :  { %875 = vpow2.f32 %v688_v24  ;;  %v691_v28 = vmul.f32 -1.442695, %v131_v27  ;;  %v208_v29 = vpop.f32.mrb[2].mxu1  ;;  %v1266_v30 = vpop.f32.mrb[3].mxu0  ;;  %v436_v24 = vld [vmem:[%s1313_s1 + $0x28] sm:$0xff] }
  0xe6   :  { %877 = vpow2.f32 %v690_v26  ;;  %v693_v31 = vmul.f32 -1.442695, %v208_v29  ;;  %v692_v32 = vmul.f32 -1.442695, %v1266_v30  ;;  %v1269_v33 = vpop.f32.mrb[3].mxu1  ;;  %v435_v26 = vld [vmem:[%s1313_s1 + $0x20] sm:$0xff] }
  0xe7   :  { %879 = vpow2.f32 %v691_v28  ;;  %v694_v34 = vmul.f32 -1.442695, %v1269_v33  ;;  %v438_v28 = vld [vmem:[%s1313_s1 + $0x38] sm:$0xff] }
  0xe8   :  { %881 = vpow2.f32 %v693_v31 }
  0xe9   :  { %883 = vpow2.f32 %v692_v32  ;;  %v279_v35 = vpop.f32.mrb[4].mxu0 }
  0xea   :  { %885 = vpow2.f32 %v694_v34  ;;  %v356_v36 = vpop.f32.mrb[4].mxu1  ;;  %v281_v37 = vpop.f32.mrb[5].mxu0 }
  0xeb   :  { %v358_v38 = vpop.f32.mrb[5].mxu1 }
  0xed   :  { %v872_v39 = vpop.eup %871  ;;  %v285_v40 = vpop.f32.mrb[6].mxu0 }
  0xee   :  { %v874_v41 = vpop.eup %873  ;;  %v391_v42 = vadd.f32 1.0, %v872_v39  ;;  %v362_v43 = vpop.f32.mrb[6].mxu1 }
  0xef   :  { %v287_v44 = vpop.f32.mrb[7].mxu0  ;;  %v876_v45 = vpop.eup %875  ;;  %v393_v46 = vadd.f32 1.0, %v874_v41 }
  0xf0   :  { %v364_v47 = vpop.f32.mrb[7].mxu1  ;;  %v878_v48 = vpop.eup %877  ;;  %887 = vrcp.f32 %v391_v42  ;;  %v392_v49 = vadd.f32 1.0, %v876_v45 }
  0xf1   :  { %v880_v50 = vpop.eup %879  ;;  %889 = vrcp.f32 %v393_v46  ;;  %v394_v51 = vadd.f32 1.0, %v878_v48 }
  0xf2   :  { %v882_v52 = vpop.eup %881  ;;  %891 = vrcp.f32 %v392_v49  ;;  %v395_v53 = vadd.f32 1.0, %v880_v50 }
  0xf3   :  { %v884_v54 = vpop.eup %883  ;;  %893 = vrcp.f32 %v394_v51  ;;  %v397_v55 = vadd.f32 1.0, %v882_v52 }
  0xf4   :  { %v886_v56 = vpop.eup %885  ;;  %895 = vrcp.f32 %v395_v53  ;;  %v396_v57 = vadd.f32 1.0, %v884_v54 }
  0xf5   :  { %897 = vrcp.f32 %v397_v55  ;;  %v398_v58 = vadd.f32 1.0, %v886_v56 }
  0xf6   :  { %899 = vrcp.f32 %v396_v57 }
  0xf7   :  { %901 = vrcp.f32 %v398_v58 }
  0xfa   :  { %v888_v59 = vpop.eup %887 }
  0xfb   :  { %v890_v60 = vpop.eup %889  ;;  %v415_v61 = vmul.f32 %v888_v59, %v125_v19 }
  0xfc   :  { %v892_v62 = vpop.eup %891  ;;  %v417_v63 = vmul.f32 %v890_v60, %v202_v21 }
  0xfd   :  { %v894_v0 = vpop.eup %893  ;;  %v416_v1 = vmul.f32 %v892_v62, %v127_v22  ;;  %v423_v2 = vmul.f32 %v415_v61, %v279_v35 }
  0xfe   :  { %v896_v3 = vpop.eup %895  ;;  %v418_v4 = vmul.f32 %v894_v0, %v204_v25  ;;  %v425_v5 = vmul.f32 %v417_v63, %v356_v36 }
  0xff   :  { %v898_v7 = vpop.eup %897  ;;  %v419_v8 = vmul.f32 %v896_v3, %v131_v27  ;;  %v424_v10 = vmul.f32 %v416_v1, %v281_v37  ;;  %v439_v21 = vmul.f32 %v431_v9, %v423_v2 }
 0x100   :  { %v900_v12 = vpop.eup %899  ;;  %v421_v13 = vmul.f32 %v898_v7, %v208_v29  ;;  %v426_v15 = vmul.f32 %v418_v4, %v358_v38  ;;  %v441_v25 = vmul.f32 %v433_v14, %v425_v5  ;;  %v437_v29 = vld [vmem:[%s1313_s1 + $0x30] sm:$0xff]  ;;  %s928_s1 = smov [#allocation2]  }
 0x101   :  { %v902_v16 = vpop.eup %901  ;;  %v420_v17 = vmul.f32 %v900_v12, %v1266_v30  ;;  %v440_v18 = vmul.f32 %v432_v6, %v424_v10  ;;  %v427_v19 = vmul.f32 %v419_v8, %v285_v40  ;;  %s668_s6 = sshll.u32 %s928_s1, 4  ;;  %s669_s6 = int_to_ptr.vmem [resolvable:$true] %s668_s6 }
 0x102   :  { %v422_v20 = vmul.f32 %v902_v16, %v1269_v33  ;;  %v442_v22 = vmul.f32 %v434_v11, %v426_v15  ;;  %v429_v23 = vmul.f32 %v421_v13, %v362_v43  ;;  %s903_s7 = scalar_lea.vmem %s669_s6, 256  ;;  %p908_p1 = scmp.lt.s32.totalorder %s669_s6, %s669_s6 }
 0x103   :  { %v428_v27 = vmul.f32 %v420_v17, %v287_v44  ;;  %575 = vmatprep.mubr.f32.mxu0 %v440_v18  ;;  %v443_v32 = vmul.f32 %v435_v26, %v427_v19  ;;  %p904_p0 = scmp.ne.s32.totalorder %s669_s6, %s903_s7  ;;  %p909_p2 = scmp.lt.s32.totalorder %s903_s7, %s903_s7 }
 0x104   :  { %v430_v30 = vmul.f32 %v422_v20, %v364_v47  ;;  %650 = vmatprep.mubr.f32.mxu1 %v442_v22  ;;  %576 = vmatmul.mubr.f32.vlgmr.msra.gmra.mrb[8].mxu0 %v439_v21  ;;  %v445_v34 = vmul.f32 %v437_v29, %v429_v23 }
 0x105   :  { %v444_v31 = vmul.f32 %v436_v24, %v428_v27  ;;  %651 = vmatmul.mubr.f32.vlgmr.msra.gmra.mrb[8].mxu1 %v441_v25  ;;  %p910_p3 = por %p909_p2, %p908_p1 }
 0x106   :  { %v446_v33 = vmul.f32 %v438_v28, %v430_v30 }
 0x107   :  { %580 = vmatprep.mubr.f32.mxu0 %v444_v31  ;;  %p911_p4 = pnand %p910_p3, %p904_p0 }
 0x108   :  { %655 = vmatprep.mubr.f32.mxu1 %v446_v33  ;;  %581 = vmatmul.mubr.f32.gmra.mrb[10].mxu0 %v443_v32 }
 0x109   :  { %656 = vmatmul.mubr.f32.gmra.mrb[10].mxu1 %v445_v34 }
 0x1d7   :  { %v727_v35 = vpop.f32.mrb[8].mxu0 }
 0x1d8   :  { %v765_v36 = vpop.f32.mrb[8].mxu1  ;;  %v728_v37 = vpop.f32.mrb[9].mxu0 }
 0x1d9   :  { %v729_v38 = vadd.f32 %v728_v37, %v727_v35  ;;  %v766_v39 = vpop.f32.mrb[9].mxu1 }
 0x1da   :  { %v767_v40 = vadd.f32 %v766_v39, %v765_v36 }
 0x1db   :  { %v730_v41 = vpop.f32.mrb[10].mxu0 }
 0x1dc   :  { %v653_v42 = vadd.f32 %v767_v40, %v729_v38  ;;  %v768_v43 = vpop.f32.mrb[10].mxu1  ;;  %v731_v44 = vpop.f32.mrb[11].mxu0 }
 0x1dd   :  { %v732_v45 = vadd.f32 %v731_v44, %v730_v41  ;;  %v769_v46 = vpop.f32.mrb[11].mxu1 }
 0x1de   :  { %661 = vst.msk [vmem:[#allocation2] sm:$0xff] %vm52_vm0, %v653_v42  ;;  %v770_v47 = vadd.f32 %v769_v46, %v768_v43 }
 0x1e0   :  { %v658_v48 = vadd.f32 %v770_v47, %v732_v45 }
 0x1e2   :  { %662 = vst.msk [vmem:[#allocation2 + $0x8] sm:$0xff] %vm52_vm0, %v658_v48 }
 0x1e3   :  { %914 = shalt.err (!%p911_p4)
}
 0x1e4   :  { %s915_s10 = scalar_lea.hbm %s1316_s4, 256 }
 0x1e5   :  { %p916_p5 = scmp.ne.s32.totalorder %s1316_s4, %s915_s10  ;;  %p919_p6 = scmp.lt.u32.totalorder %s915_s10, %s1316_s4 }
 0x1e7   :  { %p921_p7 = pnand %p919_p6, %p916_p5 }
 0x1e9   :  { %924 = shalt.err (!%p921_p7)
}
 0x1ea   :  { %s929_s15 = smov 128   ;;  %s930_s16 = smov 8  }
 0x1eb   :  { %674 = dma.vmem_to_hbm [thread:$0]  %s669_s6, 256, %s1316_s4, [#allocation3], %s929_s15, %s929_s15, %s930_s16  }
 0x1ec   :  { %925 = dma.done.wait [#allocation3], 256  }
 0x1ed   :  { %926 = vsyncadd [#allocation3], 4294967040 }
 0x1ee   :  { %678 = vsyncpa [#allocation3], 1 }

</bundles_post_ra>
